<compile_context>
chip_gen: v7x
topology: tpu7x:2x2x1
jax: 0.10.0
libtpu: 0.0.40
codegen_flags: <defaults>
</compile_context>

<pallas_src>
import jax
import jax.numpy as jnp
from jax.experimental import pallas as pl
from jax.experimental.pallas import tpu as pltpu


class BoxList:
    """Minimal stand-in for the benchmark's BoxList (only what forward needs)."""

    def __init__(self, n_boxes):
        self._n = n_boxes
        self.extra_fields = {}

    def __len__(self):
        return self._n

    def add_field(self, name, value):
        self.extra_fields[name] = value

    def get_field(self, name):
        return self.extra_fields[name]


def _squeeze_copy_kernel(x_ref, o_ref):
    # Middle singleton dim already squeezed by the BlockSpec (None entry), so
    # both refs are (TM, D): a pure vld/vst copy, no XLU / relayout work.
    o_ref[...] = x_ref[...]


def _round_up(v, m):
    return (v + m - 1) // m * m


def squeeze_dim1(x, tile_m=512):
    """Pallas kernel: (N, 1, D) -> (N, D), i.e. torch.squeeze(x, dim=1)."""
    n, one, d = x.shape
    assert one == 1

    # Sublane alignment depends on dtype packing (32-bit: 8, 16-bit: 16, 8-bit: 32).
    itemsize = jnp.dtype(x.dtype).itemsize
    align = {4: 8, 2: 16, 1: 32}.get(itemsize, 8)

    # Big tiles amortize per-grid-step overhead; clamp to the (aligned) problem
    # size so tiny inputs don't stream a mostly-padded block.
    tm = min(_round_up(tile_m, align), _round_up(n, align))
    grid = (pl.cdiv(n, tm),)  # ragged N: last (partial) block is masked by Pallas.

    return pl.pallas_call(
        _squeeze_copy_kernel,
        out_shape=jax.ShapeDtypeStruct((n, d), x.dtype),
        grid_spec=pltpu.PrefetchScalarGridSpec(
            num_scalar_prefetch=0,
            grid=grid,
            # `None` squeezes the singleton dim out of the kernel ref -> (tm, d).
            in_specs=[pl.BlockSpec((tm, None, d), lambda i: (i, 0, 0))],
            out_specs=pl.BlockSpec((tm, d), lambda i: (i, 0)),
        ),
        compiler_params=pltpu.CompilerParams(
            dimension_semantics=("parallel",),  # shards across TCs on v7x
        ),
    )(x)


class RelationPostProcessor:
    """JAX/Pallas port of the PyTorch RelationPostProcessor."""

    def __call__(self, x, boxes):
        # Hot path (squeeze copy) done once for all rows in a single Pallas
        # kernel; the per-image ragged split mirrors the reference `pos` walk.
        # TODO(synk): for many images, hand downstream (offset, length) views
        # into rel_all instead of per-box device slices to avoid per-box
        # dispatch overhead.
        rel_all = squeeze_dim1(x)
        pos = 0
        for box in boxes:
            rel_val = rel_all[pos:pos + len(box)]
            pos += len(box)
            box.add_field('relation_val', rel_val)
        return boxes


if __name__ == "__main__":
    key = jax.random.PRNGKey(0)

    # Two "images" with ragged box counts (5 and 7) to exercise the cdiv /
    # masked-tail path; relation value dim D = 128.
    boxes = [BoxList(5), BoxList(7)]
    n_total = sum(len(b) for b in boxes)
    d = 128
    x = jax.random.normal(key, (n_total, 1, d), dtype=jnp.float32)

    post = RelationPostProcessor()
    out_boxes = post(x, boxes)

    # Block on results and sanity-check against plain-JAX reference.
    pos = 0
    for box in out_boxes:
        rel = jax.block_until_ready(box.get_field('relation_val'))
        ref = jnp.squeeze(x[pos:pos + len(box)], axis=1)
        assert rel.shape == (len(box), d)
        assert jnp.allclose(rel, ref)
        pos += len(box)

    print("KERNEL_OK")
</pallas_src>

<mosaic_0001>
module attributes {stable_mosaic.version = 11 : i64} {
  func.func @_squeeze_copy_kernel(%arg0: i32, %arg1: memref<16x1x128xf32, #tpu.memory_space<vmem>>, %arg2: memref<16x128xf32, #tpu.memory_space<vmem>>) attributes {dimension_semantics = [#tpu.dimension_semantics<parallel>], iteration_bounds = array<i64: 1>, scalar_prefetch = 0 : i64, scratch_operands = 0 : i64, tpu.core_type = #tpu.core_type<tc>, window_params = [{transform_indices = @transform_0, window_bounds = array<i64: 16, 1, 128>}, {transform_indices = @transform_1, window_bounds = array<i64: 16, 128>}]} {
    %c0 = arith.constant 0 : index
    %c0_0 = arith.constant 0 : index
    %c0_1 = arith.constant 0 : index
    %0 = vector.load %arg1[%c0, %c0_0, %c0_1] : memref<16x1x128xf32, #tpu.memory_space<vmem>>, vector<16x1x128xf32>
    %1 = vector.shape_cast %0 : vector<16x1x128xf32> to vector<16x128xf32>
    %c0_2 = arith.constant 0 : index
    %c0_3 = arith.constant 0 : index
    %2 = vector.load %arg2[%c0_2, %c0_3] : memref<16x128xf32, #tpu.memory_space<vmem>>, vector<16x128xf32>
    tpu.vector_store %arg2[%c0_2, %c0_3], %1 {strides = array<i32>} : memref<16x128xf32, #tpu.memory_space<vmem>>, vector<16x128xf32>,
    return
  }
  func.func @transform_0(%arg0: i32) -> (i32, i32, i32) {
    %c0_i32 = arith.constant 0 : i32
    %c0_i32_0 = arith.constant 0 : i32
    %c0_i32_1 = arith.constant 0 : i32
    return %arg0, %c0_i32, %c0_i32_0 : i32, i32, i32
  }
  func.func @transform_1(%arg0: i32) -> (i32, i32) {
    %c0_i32 = arith.constant 0 : i32
    %c0_i32_0 = arith.constant 0 : i32
    return %arg0, %c0_i32 : i32, i32
  }
}

</mosaic_0001>

<bundles_post_ra>
// kernel: tpu_custom_call.1
= control target key start
LH: loop header
LB: loop body
LE: loop exit
PB: predicated region body
PF: predicated region fallthrough
CT: control target
= control target key end

     0   :  { %6 = vsyncpa [#allocation3], 0  ;;  %s270_s0 = inlined_call_operand.hbm [shape: f32[12,1,128], index: 0, kind: input, shape index: {}]   ;;  %s271_s1 = inlined_call_operand.hbm [shape: f32[12,128], index: 1, kind: output, shape index: {}]  }
   0x1   :  { %7 = vsyncpa [#allocation4], 0 }
   0x2   :  { %12 = vsyncadd [#allocation3], 64  ;;  %s229_s6 = smov [#allocation2]   ;;  %s181_s10 = scalar_lea.hbm %s270_s0, 192 }
   0x3   :  { %s13_s7 = sshll.u32 %s229_s6, 4  ;;  %p182_p0 = scmp.ne.s32.totalorder %s270_s0, %s181_s10  ;;  %s14_s7 = int_to_ptr.vmem [resolvable:$true] %s13_s7 }
   0x4   :  { %p185_p1 = scmp.lt.u32.totalorder %s181_s10, %s270_s0 }
   0x6   :  { %p187_p2 = pnand %p185_p1, %p182_p0 }
   0x8   :  { %190 = shalt.err (!%p187_p2)
}
   0x9   :  { %s191_s15 = scalar_lea.vmem %s14_s7, 192  ;;  %s195_s16 = scalar_lea.vmem %s14_s7, 256 }
   0xa   :  { %p192_p3 = scmp.ne.s32.totalorder %s14_s7, %s191_s15  ;;  %p196_p4 = scmp.lt.s32.totalorder %s14_s7, %s14_s7 }
   0xb   :  { %p197_p5 = scmp.lt.s32.totalorder %s195_s16, %s191_s15 }
   0xd   :  { %p198_p6 = por %p197_p5, %p196_p4 }
   0xf   :  { %p199_p7 = pnand %p198_p6, %p192_p3 }
  0x11   :  { %202 = shalt.err (!%p199_p7)
}
  0x12   :  { %s230_s17 = smov 16   ;;  %s231_s18 = smov 1  }
  0x13   :  { %19 = dma.hbm_to_vmem [thread:$0]  %s270_s0, 192, %s14_s7, [#allocation3], %s230_s17, %s230_s17, %s231_s18  }
  0x14   :  { %225 = dma.done.wait [#allocation3], 256  }
  0x15   :  { %226 = vsyncadd [#allocation3], 4294967040  ;;  %v62_v0 = vlaneseq  ;;  %v232_v1 = vmov 1966171168   ;;  %v23_v6 = vld [vmem:[#allocation2] sm:$0x1] }
  0x16   :  { %v60_v2 = vunpack.c.l.s4 %v232_v1  ;;  %v24_v7 = vld [vmem:[#allocation2 + $0x1] sm:$0x1]  ;;  %v25_v8 = vld [vmem:[#allocation2 + $0x2] sm:$0x1]  ;;  %v26_v9 = vld [vmem:[#allocation2 + $0x3] sm:$0x1] }
  0x17   :  { %v63_v3 = vshrl.u32 %v62_v0, 7  ;;  %v27_v10 = vld [vmem:[#allocation2 + $0x4] sm:$0x1]  ;;  %v28_v11 = vld [vmem:[#allocation2 + $0x5] sm:$0x1]  ;;  %v55_v12 = vcombine.low %v23_v6, %v24_v7  ;;  %v56_v15 = vcombine.low %v25_v8, %v26_v9  ;;  %s233_s0 = smov [#allocation5]  }
  0x18   :  { %v61_v4 = vunpack.c.0.s8 %v60_v2  ;;  %v29_v13 = vld [vmem:[#allocation2 + $0x6] sm:$0x1]  ;;  %v30_v14 = vld [vmem:[#allocation2 + $0x7] sm:$0x1]  ;;  %v57_v16 = vcombine.low %v27_v10, %v28_v11  ;;  %v31_v17 = vld [vmem:[#allocation2 + $0x8] sm:$0x1] }
  0x19   :  { %v58_v18 = vcombine.low %v29_v13, %v30_v14  ;;  %v32_v20 = vld [vmem:[#allocation2 + $0x9] sm:$0x1]  ;;  %v33_v21 = vld [vmem:[#allocation2 + $0xa] sm:$0x1]  ;;  %v34_v22 = vld [vmem:[#allocation2 + $0xb] sm:$0x1] }
  0x1a   :  { %v64_v5 = vsub.s32 %v61_v4, %v63_v3  ;;  %v35_v25 = vld [vmem:[#allocation2 + $0xc] sm:$0x1]  ;;  %v36_v26 = vld [vmem:[#allocation2 + $0xd] sm:$0x1]  ;;  %v37_v27 = vld [vmem:[#allocation2 + $0xe] sm:$0x1]  ;;  %v104_v28 = vcombine.low %v31_v17, %v32_v20  ;;  %v105_v29 = vcombine.low %v33_v21, %v34_v22 }
  0x1b   :  { %v38_v31 = vld [vmem:[#allocation2 + $0xf] sm:$0x1]  ;;  %v106_v32 = vcombine.low %v35_v25, %v36_v26  ;;  %s162_s21 = sshll.u32 %s233_s0, 4  ;;  %s163_s21 = int_to_ptr.vmem [resolvable:$true] %s162_s21 }
  0x1c   :  { %v65_v19 = vrot.slane %v55_v12, %v64_v5  ;;  %v72_v23 = vrot.slane %v56_v15, %v64_v5  ;;  %v79_v24 = vrot.slane %v57_v16, %v64_v5  ;;  %v86_v30 = vrot.slane %v58_v18, %v64_v5  ;;  %s203_s22 = scalar_lea.vmem %s163_s21, 256  ;;  %p208_p9 = scmp.lt.s32.totalorder %s163_s21, %s163_s21 }
  0x1d   :  { %v107_v34 = vcombine.low %v37_v27, %v38_v31  ;;  %v114_v35 = vrot.slane %v104_v28, %v64_v5  ;;  %v121_v36 = vrot.slane %v105_v29, %v64_v5  ;;  %v128_v38 = vrot.slane %v106_v32, %v64_v5  ;;  %p204_p8 = scmp.ne.s32.totalorder %s163_s21, %s203_s22  ;;  %p209_p10 = scmp.lt.s32.totalorder %s203_s22, %s203_s22 }
  0x1e   :  { %v87_v33 = vcombine.low %v65_v19, %v72_v23  ;;  %v88_v37 = vcombine.low %v79_v24, %v86_v30 }
  0x1f   :  { %v135_v40 = vrot.slane %v107_v34, %v64_v5  ;;  %v136_v41 = vcombine.low %v114_v35, %v121_v36  ;;  %p210_p11 = por %p209_p10, %p208_p9 }
  0x20   :  { %v95_v39 = vrot.slane %v87_v33, %v64_v5  ;;  %v102_v42 = vrot.slane %v88_v37, %v64_v5 }
  0x21   :  { %v137_v43 = vcombine.low %v128_v38, %v135_v40  ;;  %v144_v44 = vrot.slane %v136_v41, %v64_v5  ;;  %p211_p12 = pnand %p210_p11, %p204_p8 }
  0x22   :  { %v103_v45 = vcombine.low %v95_v39, %v102_v42 }
  0x23   :  { %v151_v46 = vrot.slane %v137_v43, %v64_v5 }
  0x24   :  { %155 = vst [vmem:[#allocation5] sm:$0xff] %v103_v45 }
  0x25   :  { %v152_v47 = vcombine.low %v144_v44, %v151_v46 }
  0x27   :  { %156 = vst [vmem:[#allocation5 + $0x8] sm:$0xff] %v152_v47 }
  0x28   :  { %214 = shalt.err (!%p211_p12)
}
  0x29   :  { %s215_s25 = scalar_lea.hbm %s271_s1, 256 }
  0x2a   :  { %p216_p13 = scmp.ne.s32.totalorder %s271_s1, %s215_s25  ;;  %p219_p0 = scmp.lt.u32.totalorder %s215_s25, %s271_s1 }
  0x2c   :  { %p221_p1 = pnand %p219_p0, %p216_p13 }
  0x2e   :  { %224 = shalt.err (!%p221_p1)
}
  0x2f   :  { %s234_s30 = smov 128   ;;  %s235_s2 = smov 8  }
  0x30   :  { %168 = dma.vmem_to_hbm [thread:$0]  %s163_s21, 256, %s271_s1, [#allocation4], %s234_s30, %s234_s30, %s235_s2  }
  0x31   :  { %227 = dma.done.wait [#allocation4], 256  }
  0x32   :  { %228 = vsyncadd [#allocation4], 4294967040 }
  0x33   :  { %172 = vsyncpa [#allocation3], 1 }
  0x34   :  { %173 = vsyncpa [#allocation4], 1 }

</bundles_post_ra>
